<compile_context>
chip_gen: v7x
topology: tpu7x:2x2x1
jax: 0.10.0
libtpu: 0.0.40
codegen_flags: <defaults>
</compile_context>

<pallas_src>
import functools
import math

import jax
import jax.numpy as jnp
from jax import lax
from jax.experimental import pallas as pl
from jax.experimental.pallas import tpu as pltpu


def _round_up(x, m):
    return ((x + m - 1) // m) * m


def _pick_tn(n, max_tn=512):
    """Largest multiple-of-128 tile <= max_tn that divides n, else full n."""
    for t in range(max_tn, 0, -128):
        if n % t == 0:
            return t
    return n


def _gelu(g, approximate):
    if approximate:
        # tanh goes to the EUP (its own VLIW slot) instead of the VALU.
        c = math.sqrt(2.0 / math.pi)
        return 0.5 * g * (1.0 + jnp.tanh(c * (g + 0.044715 * g * g * g)))
    # Exact erf-based GELU == torch.nn.functional.gelu default.
    return 0.5 * g * (1.0 + lax.erf(g * (1.0 / math.sqrt(2.0))))


def _fused_linear_kernel(x_ref, w_ref, b_ref, o_ref, *, activation, approximate):
    x = x_ref[...]                                                 # (tm, k)
    p = jnp.dot(x, w_ref[...], preferred_element_type=jnp.float32)
    p = p + b_ref[...].astype(jnp.float32)                         # (tm, wtn)
    if activation == "geglu":
        tn = p.shape[-1] // 2                                      # lane-aligned static split
        a = p[:, :tn]
        g = p[:, tn:]
        o = a * _gelu(g, approximate)
    elif activation == "gelu":
        o = _gelu(p, approximate)
    else:
        o = p
    o_ref[...] = o.astype(o_ref.dtype)


def fused_linear(x2d, w, b, *, activation="none", tm=256, tn=None, approximate=False):
    """out = epilogue(x2d @ w + b).

    x2d: (m, k);  w: (k, wn);  b: (1, wn).
    activation='geglu': wn == 2*n with per-N-tile [value | gate] interleave
    (see prepare_feedforward_params); output is (m, n).  Otherwise n == wn.
    """
    m, k = x2d.shape
    kw, wn = w.shape
    assert kw == k, (kw, k)
    n = wn // 2 if activation == "geglu" else wn
    if tn is None:
        tn = _pick_tn(n)
    wtn = 2 * tn if activation == "geglu" else tn

    tm = min(tm, _round_up(m, 8))            # sublane-aligned row tile
    gm = pl.cdiv(m, tm)
    gn = pl.cdiv(n, tn)

    in_b = jnp.dtype(x2d.dtype).itemsize
    w_b = jnp.dtype(w.dtype).itemsize
    # double-buffered x / w / b / out tiles + f32 intermediates
    footprint = (2 * tm * k * in_b + 2 * k * wtn * w_b + 2 * wtn * w_b
                 + 2 * tm * tn * in_b + 2 * tm * wtn * 4)
    vmem_limit = int(min(64 * 2**20, max(32 * 2**20, 2 * footprint)))

    flops = 2 * m * k * wn + (0 if activation == "none" else 8 * m * n)
    transcendentals = 0 if activation == "none" else m * n
    bytes_accessed = (m * k * in_b + k * wn * w_b + wn * w_b + m * n * in_b)

    kernel = functools.partial(_fused_linear_kernel,
                               activation=activation, approximate=approximate)

    return pl.pallas_call(
        kernel,
        out_shape=jax.ShapeDtypeStruct((m, n), x2d.dtype),
        grid_spec=pltpu.PrefetchScalarGridSpec(
            num_scalar_prefetch=0,
            # M innermost: the weight/bias block index only changes on the outer
            # N axis, so each weight tile is fetched once and reused for every
            # row tile (weight-bandwidth matters most on v5e).
            grid=(gn, gm),
            in_specs=[
                pl.BlockSpec((tm, k), lambda j, i: (i, 0)),     # activations
                pl.BlockSpec((k, wtn), lambda j, i: (0, j)),    # fused RHS tile
                pl.BlockSpec((1, wtn), lambda j, i: (0, j)),    # bias tile
            ],
            out_specs=pl.BlockSpec((tm, tn), lambda j, i: (i, j)),
        ),
        compiler_params=pltpu.CompilerParams(
            dimension_semantics=("parallel", "parallel"),
            vmem_limit_bytes=vmem_limit),
        cost_estimate=pl.CostEstimate(flops=flops,
                                      transcendentals=transcendentals,
                                      bytes_accessed=bytes_accessed),
    )(x2d, w, b)


def prepare_feedforward_params(w1, b1, w2, b2, *, glu, dtype=None):
    """One-time param prep (hoisted out of the per-call path).

    PyTorch layouts:  w1: (inner*(2 if glu else 1), dim), b1 matching,
                      w2: (dim_out, inner),               b2: (dim_out,).
    Weights are transposed to (in_features, out_features) so the feature axis
    stays lane-dense; for GEGLU the value/gate halves are interleaved per
    N-tile into one contiguous (dim, 2*tn) RHS block per output tile.
    Pass dtype=jnp.bfloat16 to run the MXU in bf16 (f32 accumulate kept).
    """
    if dtype is None:
        dtype = w1.dtype
    if glu:
        n = w1.shape[0] // 2
        tn1 = _pick_tn(n)
        gn = n // tn1
        wt = jnp.asarray(w1, dtype).T                  # (dim, 2n) = [value | gate]
        k = wt.shape[0]
        wa, wg = wt[:, :n], wt[:, n:]
        w1p = jnp.concatenate(
            [wa.reshape(k, gn, tn1), wg.reshape(k, gn, tn1)], axis=-1).reshape(k, 2 * n)
        b1c = jnp.asarray(b1, dtype)
        b1p = jnp.concatenate(
            [b1c[:n].reshape(gn, tn1), b1c[n:].reshape(gn, tn1)], axis=-1).reshape(1, 2 * n)
    else:
        tn1 = _pick_tn(w1.shape[0])
        w1p = jnp.asarray(w1, dtype).T
        b1p = jnp.asarray(b1, dtype).reshape(1, -1)
    w2p = jnp.asarray(w2, dtype).T
    b2p = jnp.asarray(b2, dtype).reshape(1, -1)
    return {"w1": w1p, "b1": b1p, "tn1": tn1, "w2": w2p, "b2": b2p, "glu": glu}


def feedforward(x, params, *, tm=256, approximate=False):
    """FeedForward.forward: project_in -> Dropout(p=0) -> Linear."""
    lead = x.shape[:-1]
    k = x.shape[-1]
    m = 1
    for s in lead:
        m *= s
    x2d = x.reshape(m, k).astype(params["w1"].dtype)   # pin dtype explicitly

    act = "geglu" if params["glu"] else "gelu"
    h = fused_linear(x2d, params["w1"], params["b1"],
                     activation=act, tm=tm, tn=params["tn1"], approximate=approximate)
    # TODO(synk): Dropout with p>0 (training-time RNG mask) not implemented;
    # the module default p=0.0 (and eval mode) is an identity.
    out = fused_linear(h, params["w2"], params["b2"], activation="none", tm=tm)
    # TODO(synk): if dim_out is not a multiple of 128, padding the output
    # feature axis in the wrapper would avoid masked partial stores.
    return out.reshape(*lead, out.shape[-1])


# ----------------------------- reference --------------------------------- #

def _ref_feedforward(x, w1, b1, w2, b2, *, glu):
    p = jnp.einsum("...i,oi->...o", x, w1) + b1
    if glu:
        a, g = jnp.split(p, 2, axis=-1)
        h = a * jax.nn.gelu(g, approximate=False)
    else:
        h = jax.nn.gelu(p, approximate=False)
    return jnp.einsum("...i,oi->...o", h, w2) + b2


if __name__ == "__main__":
    batch, seq, dim, mult = 2, 8, 32, 4
    inner = dim * mult          # 128
    dim_out = dim               # default(dim_out, dim)

    key = jax.random.PRNGKey(0)
    kx, k1w, k1b, k2w, k2b, k3w, k3b = jax.random.split(key, 7)
    x = jax.random.normal(kx, (batch, seq, dim), jnp.float32)

    def linear_init(kw_, kb_, out_f, in_f):
        bound = 1.0 / math.sqrt(in_f)
        w = jax.random.uniform(kw_, (out_f, in_f), jnp.float32, -bound, bound)
        b = jax.random.uniform(kb_, (out_f,), jnp.float32, -bound, bound)
        return w, b

    # glu=False (module default): Linear(dim, inner) + GELU, then Linear(inner, dim_out).
    w1, b1 = linear_init(k1w, k1b, inner, dim)
    w2, b2 = linear_init(k2w, k2b, dim_out, inner)
    params = prepare_feedforward_params(w1, b1, w2, b2, glu=False)
    out = jax.block_until_ready(feedforward(x, params))
    ref = _ref_feedforward(x, w1, b1, w2, b2, glu=False)
    assert out.shape == (batch, seq, dim_out), out.shape
    assert jnp.allclose(out, ref, atol=1e-4, rtol=1e-4), float(jnp.max(jnp.abs(out - ref)))

    # glu=True path: GEGLU(dim, inner) project_in, same output Linear.
    w1g, b1g = linear_init(k3w, k3b, inner * 2, dim)
    params_g = prepare_feedforward_params(w1g, b1g, w2, b2, glu=True)
    out_g = jax.block_until_ready(feedforward(x, params_g))
    ref_g = _ref_feedforward(x, w1g, b1g, w2, b2, glu=True)
    assert out_g.shape == (batch, seq, dim_out), out_g.shape
    assert jnp.allclose(out_g, ref_g, atol=1e-4, rtol=1e-4), float(jnp.max(jnp.abs(out_g - ref_g)))

    print("KERNEL_OK")
</pallas_src>

<mosaic_0001>
module attributes {stable_mosaic.version = 11 : i64} {
  func.func @_fused_linear_kernel(%arg0: i32, %arg1: i32, %arg2: memref<16x32xf32, #tpu.memory_space<vmem>>, %arg3: memref<32x128xf32, #tpu.memory_space<vmem>>, %arg4: memref<1x128xf32, #tpu.memory_space<vmem>>, %arg5: memref<16x128xf32, #tpu.memory_space<vmem>>) attributes {dimension_semantics = [#tpu.dimension_semantics<parallel>, #tpu.dimension_semantics<parallel>], iteration_bounds = array<i64: 1, 1>, scalar_prefetch = 0 : i64, scratch_operands = 0 : i64, tpu.core_type = #tpu.core_type<tc>, window_params = [{transform_indices = @transform_0, window_bounds = array<i64: 16, 32>}, {transform_indices = @transform_1, window_bounds = array<i64: 32, 128>}, {transform_indices = @transform_2, window_bounds = array<i64: 1, 128>}, {transform_indices = @transform_3, window_bounds = array<i64: 16, 128>}]} {
    %c0 = arith.constant 0 : index
    %c0_0 = arith.constant 0 : index
    %0 = vector.load %arg2[%c0, %c0_0] : memref<16x32xf32, #tpu.memory_space<vmem>>, vector<16x32xf32>
    %c0_1 = arith.constant 0 : index
    %c0_2 = arith.constant 0 : index
    %1 = vector.load %arg3[%c0_1, %c0_2] : memref<32x128xf32, #tpu.memory_space<vmem>>, vector<32x128xf32>
    %cst = arith.constant dense<0.000000e+00> : vector<16x128xf32>
    %2 = tpu.matmul %0, %1, %cst {dimension_numbers = #tpu.dot_dimension_numbers<[1], [0], [0], [1], [0, 0, 1, 1], [], []>} : vector<16x32xf32>, vector<32x128xf32>, vector<16x128xf32> -> vector<16x128xf32>
    %c0_3 = arith.constant 0 : index
    %c0_4 = arith.constant 0 : index
    %3 = vector.load %arg4[%c0_3, %c0_4] : memref<1x128xf32, #tpu.memory_space<vmem>>, vector<1x128xf32>
    %4 = vector.broadcast %3 : vector<1x128xf32> to vector<16x128xf32>
    %5 = arith.addf %2, %4 : vector<16x128xf32>
    %cst_5 = arith.constant 5.000000e-01 : f32
    %6 = vector.broadcast %cst_5 : f32 to vector<16x128xf32>
    %7 = arith.mulf %6, %5 : vector<16x128xf32>
    %cst_6 = arith.constant 0.707106769 : f32
    %8 = vector.broadcast %cst_6 : f32 to vector<16x128xf32>
    %9 = arith.mulf %5, %8 : vector<16x128xf32>
    %10 = math.erf %9 : vector<16x128xf32>
    %cst_7 = arith.constant 1.000000e+00 : f32
    %11 = vector.broadcast %cst_7 : f32 to vector<16x128xf32>
    %12 = arith.addf %11, %10 : vector<16x128xf32>
    %13 = arith.mulf %7, %12 : vector<16x128xf32>
    %c0_8 = arith.constant 0 : index
    %c0_9 = arith.constant 0 : index
    %14 = vector.load %arg5[%c0_8, %c0_9] : memref<16x128xf32, #tpu.memory_space<vmem>>, vector<16x128xf32>
    tpu.vector_store %arg5[%c0_8, %c0_9], %13 {strides = array<i32>} : memref<16x128xf32, #tpu.memory_space<vmem>>, vector<16x128xf32>,
    return
  }
  func.func @transform_0(%arg0: i32, %arg1: i32) -> (i32, i32) {
    %c0_i32 = arith.constant 0 : i32
    %c0_i32_0 = arith.constant 0 : i32
    return %arg1, %c0_i32 : i32, i32
  }
  func.func @transform_1(%arg0: i32, %arg1: i32) -> (i32, i32) {
    %c0_i32 = arith.constant 0 : i32
    %c0_i32_0 = arith.constant 0 : i32
    return %c0_i32, %arg0 : i32, i32
  }
  func.func @transform_2(%arg0: i32, %arg1: i32) -> (i32, i32) {
    %c0_i32 = arith.constant 0 : i32
    %c0_i32_0 = arith.constant 0 : i32
    return %c0_i32, %arg0 : i32, i32
  }
  func.func @transform_3(%arg0: i32, %arg1: i32) -> (i32, i32) {
    %c0_i32 = arith.constant 0 : i32
    return %arg1, %arg0 : i32, i32
  }
}

</mosaic_0001>

<bundles_post_ra>
// kernel: tpu_custom_call.1
= control target key start
LH: loop header
LB: loop body
LE: loop exit
PB: predicated region body
PF: predicated region fallthrough
CT: control target
= control target key end

     0   :  { %8 = vsyncpa [#allocation3], 0  ;;  %s350_s0 = inlined_call_operand.hbm [shape: f32[16,32], index: 0, kind: input, shape index: {}]   ;;  %s351_s1 = inlined_call_operand.hbm [shape: f32[32,128], index: 1, kind: input, shape index: {}]   ;;  %s352_s2 = inlined_call_operand.vmem [shape: f32[1,128], index: 2, kind: input, shape index: {}]   ;;  %s353_s3 = inlined_call_operand.hbm [shape: f32[16,128], index: 3, kind: output, shape index: {}]  }
   0x1   :  { %9 = vsyncpa [#allocation6], 0 }
   0x2   :  { %10 = vsyncpa [#allocation4], 0  ;;  %s277_s12 = smov [#allocation2]   ;;  %s205_s16 = scalar_lea.hbm %s350_s0, 256 }
   0x3   :  { %s16_s13 = sshll.u32 %s277_s12, 4  ;;  %p206_p0 = scmp.ne.s32.totalorder %s350_s0, %s205_s16  ;;  %s17_s13 = int_to_ptr.vmem [resolvable:$true] %s16_s13 }
   0x4   :  { %p209_p1 = scmp.lt.u32.totalorder %s205_s16, %s350_s0 }
   0x6   :  { %p211_p2 = pnand %p209_p1, %p206_p0 }
   0x8   :  { %214 = shalt.err (!%p211_p2)
}
   0x9   :  { %s215_s21 = scalar_lea.vmem %s17_s13, 256  ;;  %p220_p4 = scmp.lt.s32.totalorder %s17_s13, %s17_s13 }
   0xa   :  { %p216_p3 = scmp.ne.s32.totalorder %s17_s13, %s215_s21  ;;  %p221_p5 = scmp.lt.s32.totalorder %s215_s21, %s215_s21 }
   0xc   :  { %p222_p6 = por %p221_p5, %p220_p4 }
   0xe   :  { %p223_p7 = pnand %p222_p6, %p216_p3 }
  0x10   :  { %226 = shalt.err (!%p223_p7)
}
  0x11   :  { %s278_s22 = smov 128   ;;  %s279_s23 = smov 8  }
  0x12   :  { %22 = dma.hbm_to_vmem [thread:$0]  %s350_s0, 256, %s17_s13, [#allocation3], %s278_s22, %s278_s22, %s279_s23  }
  0x13   :  { %s280_s26 = smov [#allocation5]   ;;  %s227_s30 = scalar_lea.hbm %s351_s1, 512 }
  0x14   :  { %s28_s27 = sshll.u32 %s280_s26, 4  ;;  %p228_p8 = scmp.ne.s32.totalorder %s351_s1, %s227_s30  ;;  %s29_s27 = int_to_ptr.vmem [resolvable:$true] %s28_s27 }
  0x15   :  { %p231_p9 = scmp.lt.u32.totalorder %s227_s30, %s351_s1 }
  0x17   :  { %p233_p10 = pnand %p231_p9, %p228_p8 }
  0x19   :  { %236 = shalt.err (!%p233_p10)
}
  0x1a   :  { %s237_s8 = scalar_lea.vmem %s29_s27, 512  ;;  %p242_p12 = scmp.lt.s32.totalorder %s29_s27, %s29_s27 }
  0x1b   :  { %p238_p11 = scmp.ne.s32.totalorder %s29_s27, %s237_s8  ;;  %p243_p13 = scmp.lt.s32.totalorder %s237_s8, %s237_s8 }
  0x1d   :  { %p244_p0 = por %p243_p13, %p242_p12 }
  0x1f   :  { %p245_p1 = pnand %p244_p0, %p238_p11 }
  0x21   :  { %248 = shalt.err (!%p245_p1)
}
  0x22   :  { %34 = dma.hbm_to_vmem [thread:$0]  %s351_s1, 512, %s29_s27, [#allocation6], %s278_s22, %s278_s22, %s279_s23  }
  0x23   :  { %271 = dma.done.wait [#allocation3], 256  }
  0x24   :  { %272 = vsyncadd [#allocation3], 4294967040 }
  0x25   :  { %273 = dma.done.wait [#allocation6], 512  }
  0x26   :  { %274 = vsyncadd [#allocation6], 4294966784  ;;  %vm56_vm0 = vcmask 261120   ;;  %v45_v0 = vld [vmem:[#allocation5] sm:$0xff]  ;;  %v46_v1 = vld [vmem:[#allocation5 + $0x8] sm:$0xff]  ;;  %s281_s11 = smov [#allocation7]  }
  0x27   :  { %v47_v2 = vld [vmem:[#allocation5 + $0x10] sm:$0xff]  ;;  %v188_v3 = vpack.c.bf16 %v46_v1, %v45_v0  ;;  %v48_v4 = vld [vmem:[#allocation5 + $0x18] sm:$0xff]  ;;  %s155_s12 = sshll.u32 %s281_s11, 4  ;;  %s156_s12 = int_to_ptr.vmem [resolvable:$true] %s155_s12 }
  0x28   :  { %v43_v5 = vld [vmem:[#allocation2] sm:$0xff]  ;;  %v192_v6 = vpack.c.bf16 %v48_v4, %v47_v2  ;;  %v44_v7 = vld [vmem:[#allocation2 + $0x8] sm:$0xff]  ;;  %p254_p3 = scmp.lt.s32.totalorder %s156_s12, %s156_s12 }
  0x29   :  { %185 = vmatprep.mubr.msk.f32.mxu0 %vm56_vm0, %v43_v5  ;;  %189 = vmatprep.subr.bf16.mxu0 %v188_v3  ;;  %v168_v8 = vld [vmem:[%s352_s2] ss:$0 sm:$0xff]  ;;  %s249_s2 = scalar_lea.vmem %s156_s12, 256 }
  0x2a   :  { %191 = vmatpush3.bf16.msra.mxu0 %v188_v3  ;;  %p250_p2 = scmp.ne.s32.totalorder %s156_s12, %s249_s2  ;;  %p255_p4 = scmp.lt.s32.totalorder %s249_s2, %s249_s2 }
  0x2b   :  { %193 = vmatprep.subr.bf16.mxu0 %v192_v6 }
  0x2c   :  { %p256_p5 = por %p255_p4, %p254_p3 }
  0x2e   :  { %195 = vmatpush3.bf16.msra.mxu0 %v192_v6  ;;  %p257_p6 = pnand %p256_p5, %p250_p2 }
  0x31   :  { %186 = vmatmul.mubr.msk.f32.vlgmr.msra.gmra.mrb[0].mxu0 %vm56_vm0, %v44_v7 }
 0x104   :  { %v187_v9 = vpop.f32.mrb[0].mxu0 }
 0x105   :  { %v135_v10 = vadd.f32 %v187_v9, %v168_v8  ;;  %v129_v11 = vpop.f32.mrb[1].mxu0 }
 0x106   :  { %v130_v12 = vadd.f32 %v168_v8, %v129_v11 }
 0x107   :  { %v141_v13 = vmul.f32 0.70710677, %v135_v10  ;;  %v139_v17 = vmul.f32 0.5, %v135_v10 }
 0x108   :  { %v140_v14 = vmul.f32 0.70710677, %v130_v12  ;;  %v138_v19 = vmul.f32 0.5, %v130_v12 }
 0x109   :  { %201 = verf.f32 %v141_v13 }
 0x10a   :  { %203 = verf.f32 %v140_v14 }
 0x113   :  { %v202_v15 = vpop.eup %201 }
 0x114   :  { %v204_v16 = vpop.eup %203  ;;  %v145_v18 = vadd.f32 1.0, %v202_v15 }
 0x115   :  { %v144_v20 = vadd.f32 1.0, %v204_v16 }
 0x116   :  { %v147_v21 = vmul.f32 %v145_v18, %v139_v17 }
 0x117   :  { %v146_v22 = vmul.f32 %v144_v20, %v138_v19 }
 0x118   :  { %149 = vst [vmem:[#allocation7 + $0x8] sm:$0xff] %v147_v21 }
 0x119   :  { %148 = vst [vmem:[#allocation7] sm:$0xff] %v146_v22 }
 0x11a   :  { %260 = shalt.err (!%p257_p6)
}
 0x11b   :  { %s261_s15 = scalar_lea.hbm %s353_s3, 256 }
 0x11c   :  { %p262_p7 = scmp.ne.s32.totalorder %s353_s3, %s261_s15  ;;  %p265_p8 = scmp.lt.u32.totalorder %s261_s15, %s353_s3 }
 0x11e   :  { %p267_p9 = pnand %p265_p8, %p262_p7 }
 0x120   :  { %270 = shalt.err (!%p267_p9)
}
 0x121   :  { %161 = dma.vmem_to_hbm [thread:$0]  %s156_s12, 256, %s353_s3, [#allocation4], %s278_s22, %s278_s22, %s279_s23  }
 0x122   :  { %275 = dma.done.wait [#allocation4], 256  }
 0x123   :  { %276 = vsyncadd [#allocation4], 4294967040 }
 0x124   :  { %165 = vsyncpa [#allocation3], 1 }
 0x125   :  { %166 = vsyncpa [#allocation6], 1 }
 0x126   :  { %167 = vsyncpa [#allocation4], 1 }

</bundles_post_ra>
